<compile_context>
chip_gen: v7x
topology: tpu7x:2x2x1
jax: 0.10.0
libtpu: 0.0.40
codegen_flags: <defaults>
</compile_context>

<pallas_src>
import functools

import jax
import jax.numpy as jnp
from jax.experimental import pallas as pl
from jax.experimental.pallas import tpu as pltpu


def _round_up(x, m):
    return ((x + m - 1) // m) * m


def _vmem():
    return pl.BlockSpec(memory_space=pltpu.MemorySpace.VMEM)


# Weight-slab block indices (packed once at init, bf16, zero-padded to [P,P]).
_W1, _W2, _W3, _W45, _WD1, _WD1S, _WD2, _WD3 = range(8)
# Bias-slab row indices (f32, zero-padded to [8, P]).
_B1, _B2, _B3, _B45, _BD1, _BD2, _BD3 = range(7)


def _bias(b_ref, row):
    # Per-use [1, P] ref load; the add broadcasts it over the batch sublanes.
    return b_ref[row:row + 1, :]


# ----------------------------------------------------------------------------
# In-kernel math helpers (shared between the two kernels).
# ----------------------------------------------------------------------------
def _semantic_head_compute(h_cat, w_ref, b_ref):
    """Semantic projection + predictor.

    h_cat: [B, 2E] f32 = concat(h_image, h_graph), un-padded.
    Weight blocks are zero-padded [P, P] bf16; padded rows/cols contribute
    exact zeros, so the chain matches the un-padded math.  MXU dots take bf16
    operands and accumulate in f32; bias adds / ReLU stay in f32.
    """
    f32, bf16 = jnp.float32, jnp.bfloat16
    two_e = h_cat.shape[-1]
    # concat(h_image, h_graph) @ W1 — single dot, K = 2E (weight rows sliced
    # to the valid range; no activation padding needed).
    z1 = jnp.dot(h_cat.astype(bf16), w_ref[_W1, 0:two_e, :],
                 preferred_element_type=f32) + _bias(b_ref, _B1)
    z1 = jnp.maximum(z1, 0.0)                                         # ReLU
    h_sem = (jnp.dot(z1.astype(bf16), w_ref[_W2], preferred_element_type=f32)
             + _bias(b_ref, _B2))
    # semantic_predictor: Dropout(eval = identity) -> Linear -> ReLU
    #                     -> (Linear(2E,C) . Linear(C,C)) folded into one.
    z3 = jnp.maximum(
        jnp.dot(h_sem.astype(bf16), w_ref[_W3], preferred_element_type=f32)
        + _bias(b_ref, _B3), 0.0)
    p_sem = (jnp.dot(z3.astype(bf16), w_ref[_W45], preferred_element_type=f32)
             + _bias(b_ref, _B45))
    return h_sem, p_sem


# ----------------------------------------------------------------------------
# Kernel 1: semantic head only ('feat' / 'pred' goals) — one launch.
# ----------------------------------------------------------------------------
def _semantic_head_kernel(h_ref, w_ref, b_ref, h_sem_ref, p_sem_ref):
    h_sem, p_sem = _semantic_head_compute(h_ref[...], w_ref, b_ref)
    h_sem_ref[...] = h_sem.astype(h_sem_ref.dtype)
    p_sem_ref[...] = p_sem.astype(p_sem_ref.dtype)


# ----------------------------------------------------------------------------
# Kernel 2: fully fused 'dann' path — semantic head + 3x domain classifier,
# single launch.
# ----------------------------------------------------------------------------
def _semantic_dann_kernel(h_ref, w_ref, b_ref, p_sem_ref, p_dom_ref):
    f32, bf16 = jnp.float32, jnp.bfloat16
    h_cat = h_ref[...]                                     # [B, 2E] f32
    two_e = h_cat.shape[-1]
    h_sem, p_sem = _semantic_head_compute(h_cat, w_ref, b_ref)
    p_sem_ref[...] = p_sem.astype(p_sem_ref.dtype)

    # domain_classifier (GRL fwd = identity, Dropout(0.5) eval = identity).
    # Layer 1: image lives in lanes [0:E] of h_cat -> plain Wd1 (rows E: are
    # zero); graph lives in lanes [E:2E] -> row-shifted copy of Wd1.  These
    # two dots only depend on h_cat (available at kernel entry) so they can
    # overlap with the semantic chain.
    hc_b = h_cat.astype(bf16)
    bd1 = _bias(b_ref, _BD1)
    z_g = jnp.maximum(jnp.dot(hc_b, w_ref[_WD1S, 0:two_e, :],
                              preferred_element_type=f32) + bd1, 0.0)
    z_i = jnp.maximum(jnp.dot(hc_b, w_ref[_WD1, 0:two_e, :],
                              preferred_element_type=f32) + bd1, 0.0)
    z_s = jnp.maximum(jnp.dot(h_sem.astype(bf16), w_ref[_WD1],
                              preferred_element_type=f32) + bd1, 0.0)
    # Batch layers 2/3 over the 3 domain inputs -> one MXU push each.
    zd = jnp.concatenate([z_g, z_i, z_s], axis=0)          # [3B, P]
    z2 = jnp.maximum(
        jnp.dot(zd.astype(bf16), w_ref[_WD2], preferred_element_type=f32)
        + _bias(b_ref, _BD2), 0.0)
    p_dom = (jnp.dot(z2.astype(bf16), w_ref[_WD3], preferred_element_type=f32)
             + _bias(b_ref, _BD3))
    p_dom_ref[...] = p_dom.astype(p_dom_ref.dtype)


# ----------------------------------------------------------------------------
# Parameter initialization (deterministic, in-script) + packing into slabs.
# ----------------------------------------------------------------------------
def init_params(key, emb_dim, num_classes):
    E, C = emb_dim, num_classes
    ks = jax.random.split(key, 16)

    def lin(kw, kb, fan_in, fan_out):
        # Like nn.Linear default init, stored as [in, out] (x @ W + b).
        bound = 1.0 / jnp.sqrt(fan_in)
        w = jax.random.uniform(kw, (fan_in, fan_out), jnp.float32, -bound, bound)
        b = jax.random.uniform(kb, (1, fan_out), jnp.float32, -bound, bound)
        return w, b

    p = {}
    # semantic_projection
    p["w1"], p["b1"] = lin(ks[0], ks[1], 2 * E, 2 * E)
    p["w2"], p["b2"] = lin(ks[2], ks[3], 2 * E, E)
    # spu_mlp
    p["w3"], p["b3"] = lin(ks[4], ks[5], E, 2 * E)
    p["w4"], p["b4"] = lin(ks[6], ks[7], 2 * E, C)
    # cq
    p["w5"], p["b5"] = lin(ks[8], ks[9], C, C)
    # domain_classifier
    p["wd1"], p["bd1"] = lin(ks[10], ks[11], E, 128)
    p["wd2"], p["bd2"] = lin(ks[12], ks[13], 128, 64)
    p["wd3"], p["bd3"] = lin(ks[14], ks[15], 64, C)
    return p


def pack_params(p, emb_dim, num_classes):
    """Pack all weights/biases (done once) into lane-padded VMEM-friendly slabs."""
    E, C = emb_dim, num_classes
    P = _round_up(max(2 * E, C, 128), 128)

    def pad_w(w, row_off=0):
        out = jnp.zeros((P, P), jnp.float32)
        return out.at[row_off:row_off + w.shape[0], :w.shape[1]].set(w)

    def pad_b(b):
        b = jnp.reshape(b, (-1,))
        return jnp.zeros((P,), jnp.float32).at[: b.shape[0]].set(b)

    # Fold cq into the last spu_mlp Linear (no nonlinearity between them):
    #   (z @ w4 + b4) @ w5 + b5 == z @ (w4 @ w5) + (b4 @ w5 + b5)
    w45 = p["w4"] @ p["w5"]
    b45 = p["b4"] @ p["w5"] + p["b5"]

    # One bf16 weight slab (halves the weight DMA vs f32).
    w_all = jnp.stack([
        pad_w(p["w1"]),               # _W1    rows [0:2E]
        pad_w(p["w2"]),               # _W2    rows [0:2E]
        pad_w(p["w3"]),               # _W3    rows [0:E]
        pad_w(w45),                   # _W45   rows [0:2E]
        pad_w(p["wd1"]),              # _WD1   rows [0:E]  (image / h_sem lanes)
        pad_w(p["wd1"], row_off=E),   # _WD1S  rows [E:2E] (graph lanes of h_cat)
        pad_w(p["wd2"]),              # _WD2
        pad_w(p["wd3"]),              # _WD3
    ]).astype(jnp.bfloat16)                                        # [8, P, P]

    b_all = jnp.stack([pad_b(p["b1"]), pad_b(p["b2"]), pad_b(p["b3"]),
                       pad_b(b45), pad_b(p["bd1"]), pad_b(p["bd2"]),
                       pad_b(p["bd3"]), jnp.zeros((P,), jnp.float32)])  # [8, P]
    return w_all, b_all


# ----------------------------------------------------------------------------
# Wrappers calling pallas_call (one launch each).
# ----------------------------------------------------------------------------
@functools.partial(jax.jit, static_argnames=("emb_dim", "num_classes"))
def semantic_head(h_image, h_graph, w_all, b_all, *, emb_dim, num_classes):
    B = h_image.shape[0]
    E, C = emb_dim, num_classes
    P = w_all.shape[-1]
    # Only wrapper-side pre-op: a tiny [B, 2E] concat (one fused XLA op).
    h_cat = jnp.concatenate(
        [h_image.astype(jnp.float32), h_graph.astype(jnp.float32)], axis=1)
    cost = pl.CostEstimate(
        flops=2 * B * P * P * 4, transcendentals=0,
        bytes_accessed=(w_all.size * 2 + b_all.size * 4
                        + B * 2 * E * 4 + 2 * B * P * 4))
    h_sem_p, p_sem_p = pl.pallas_call(
        _semantic_head_kernel,
        out_shape=(jax.ShapeDtypeStruct((B, P), jnp.float32),   # h_semantic (padded)
                   jax.ShapeDtypeStruct((B, P), jnp.float32)),  # p_semantic (padded)
        in_specs=[_vmem(), _vmem(), _vmem()],
        out_specs=(_vmem(), _vmem()),
        cost_estimate=cost,
    )(h_cat, w_all, b_all)
    return h_sem_p[:, :E], p_sem_p[:, :C]


@functools.partial(jax.jit, static_argnames=("emb_dim", "num_classes"))
def semantic_dann(h_image, h_graph, w_all, b_all, *, emb_dim, num_classes):
    B = h_image.shape[0]
    E, C = emb_dim, num_classes
    P = w_all.shape[-1]
    h_cat = jnp.concatenate(
        [h_image.astype(jnp.float32), h_graph.astype(jnp.float32)], axis=1)
    cost = pl.CostEstimate(
        flops=2 * B * P * P * 7 + 2 * 3 * B * P * P * 2, transcendentals=0,
        bytes_accessed=(w_all.size * 2 + b_all.size * 4
                        + B * 2 * E * 4 + 4 * B * P * 4))
    p_sem_p, p_dom_p = pl.pallas_call(
        _semantic_dann_kernel,
        out_shape=(jax.ShapeDtypeStruct((B, P), jnp.float32),       # p_semantic (padded)
                   jax.ShapeDtypeStruct((3 * B, P), jnp.float32)),  # 3x p_*_domain (padded)
        in_specs=[_vmem(), _vmem(), _vmem()],
        out_specs=(_vmem(), _vmem()),
        cost_estimate=cost,
    )(h_cat, w_all, b_all)
    p_dom = p_dom_p.reshape(3, B, P)[:, :, :C]
    # order matches the stacking inside the kernel: h_graph, h_image, h_semantic
    return p_sem_p[:, :C], p_dom[0], p_dom[1], p_dom[2]


def semantic_encoder_forward(h_graph, h_image, packed, *, emb_dim, num_classes,
                             alpha=0.0, goal="feat"):
    """Mirrors SemanticEncoder.forward downstream of the sub-encoders."""
    w_all, b_all = packed
    atom_weight = None  # TODO(synk): produced by GraphEncoder (not in provided source).
    if goal == "pred":
        _, p_semantic = semantic_head(h_image, h_graph, w_all, b_all,
                                      emb_dim=emb_dim, num_classes=num_classes)
        return p_semantic
    elif goal == "dann":
        SUC_loss = 0.0  # TODO(synk): mmc_2 not defined in the provided source.
        # GRL.apply is identity in the forward pass (alpha only affects backward).
        p_semantic, p_graph_domain, p_image_domain, p_semantic_domain = semantic_dann(
            h_image, h_graph, w_all, b_all,
            emb_dim=emb_dim, num_classes=num_classes)
        return (p_semantic, p_graph_domain, p_image_domain, p_semantic_domain,
                SUC_loss, None, None)
    else:
        h_semantic, p_semantic = semantic_head(h_image, h_graph, w_all, b_all,
                                               emb_dim=emb_dim, num_classes=num_classes)
        return (h_semantic, p_semantic, h_image, h_graph, atom_weight)


# ----------------------------------------------------------------------------
# Pure-JAX reference for verification (original, un-folded f32 params).
# ----------------------------------------------------------------------------
def _reference(h_image, h_graph, p):
    h_cat = jnp.concatenate([h_image, h_graph], axis=1)
    z1 = jnp.maximum(h_cat @ p["w1"] + p["b1"], 0.0)
    h_sem = z1 @ p["w2"] + p["b2"]
    z3 = jnp.maximum(h_sem @ p["w3"] + p["b3"], 0.0)
    p_sem = (z3 @ p["w4"] + p["b4"]) @ p["w5"] + p["b5"]

    def dom(h):
        a = jnp.maximum(h @ p["wd1"] + p["bd1"], 0.0)
        b = jnp.maximum(a @ p["wd2"] + p["bd2"], 0.0)
        return b @ p["wd3"] + p["bd3"]

    return h_sem, p_sem, dom(h_graph), dom(h_image), dom(h_sem)


if __name__ == "__main__":
    B = 8            # batch (multiple of 8: f32 sublane tile)
    EMB_DIM = 32     # args.emb_dim
    NUM_CLASSES = 4  # args.num_classes

    key = jax.random.PRNGKey(0)
    k_img, k_gr, k_par = jax.random.split(key, 3)
    h_image = jax.random.normal(k_img, (B, EMB_DIM), jnp.float32)
    h_graph = jax.random.normal(k_gr, (B, EMB_DIM), jnp.float32)
    params = init_params(k_par, EMB_DIM, NUM_CLASSES)
    packed = pack_params(params, EMB_DIM, NUM_CLASSES)  # packed once at init

    # 'feat' path (one pallas_call)
    feat_out = semantic_encoder_forward(
        h_graph, h_image, packed, emb_dim=EMB_DIM, num_classes=NUM_CLASSES,
        goal="feat")
    # 'pred' path (same kernel)
    pred_out = semantic_encoder_forward(
        h_graph, h_image, packed, emb_dim=EMB_DIM, num_classes=NUM_CLASSES,
        goal="pred")
    # 'dann' path (one fused pallas_call: semantic head + 3x domain classifier)
    dann_out = semantic_encoder_forward(
        h_graph, h_image, packed, emb_dim=EMB_DIM, num_classes=NUM_CLASSES,
        alpha=0.5, goal="dann")

    jax.block_until_ready((feat_out, pred_out, dann_out))

    # Verify against pure-JAX f32 reference.  Tolerances relaxed vs. the f32
    # version because weights (and dot operands) are bf16 in the kernel.
    TOL = dict(atol=5e-2, rtol=5e-2)
    h_sem, p_sem = feat_out[0], feat_out[1]
    r_hsem, r_psem, r_pg, r_pi, r_ps = _reference(h_image, h_graph, params)
    assert jnp.allclose(h_sem, r_hsem, **TOL)
    assert jnp.allclose(p_sem, r_psem, **TOL)
    assert jnp.allclose(pred_out, r_psem, **TOL)
    assert jnp.allclose(dann_out[0], r_psem, **TOL)
    assert jnp.allclose(dann_out[1], r_pg, **TOL)
    assert jnp.allclose(dann_out[2], r_pi, **TOL)
    assert jnp.allclose(dann_out[3], r_ps, **TOL)

    print("KERNEL_OK")
</pallas_src>

<mosaic_0001>
module attributes {stable_mosaic.version = 11 : i64} {
  func.func @_semantic_head_kernel(%arg0: memref<8x64xf32, #tpu.memory_space<vmem>>, %arg1: memref<8x128x128xbf16, #tpu.memory_space<vmem>>, %arg2: memref<8x128xf32, #tpu.memory_space<vmem>>, %arg3: memref<8x128xf32, #tpu.memory_space<vmem>>, %arg4: memref<8x128xf32, #tpu.memory_space<vmem>>) attributes {dimension_semantics = [], scalar_prefetch = 0 : i64, scratch_operands = 0 : i64, tpu.core_type = #tpu.core_type<tc>} {
    %c0 = arith.constant 0 : index
    %c0_0 = arith.constant 0 : index
    %0 = vector.load %arg0[%c0, %c0_0] : memref<8x64xf32, #tpu.memory_space<vmem>>, vector<8x64xf32>
    %1 = arith.truncf %0 : vector<8x64xf32> to vector<8x64xbf16>
    %c0_1 = arith.constant 0 : index
    %c0_2 = arith.constant 0 : index
    %c0_3 = arith.constant 0 : index
    %2 = vector.load %arg1[%c0_1, %c0_2, %c0_3] : memref<8x128x128xbf16, #tpu.memory_space<vmem>>, vector<1x64x128xbf16>
    %3 = vector.shape_cast %2 : vector<1x64x128xbf16> to vector<64x128xbf16>
    %cst = arith.constant dense<0.000000e+00> : vector<8x128xf32>
    %4 = tpu.matmul %1, %3, %cst {dimension_numbers = #tpu.dot_dimension_numbers<[1], [0], [0], [1], [0, 0, 1, 1], [], []>} : vector<8x64xbf16>, vector<64x128xbf16>, vector<8x128xf32> -> vector<8x128xf32>
    %c0_4 = arith.constant 0 : index
    %c0_5 = arith.constant 0 : index
    %5 = vector.load %arg2[%c0_4, %c0_5] : memref<8x128xf32, #tpu.memory_space<vmem>>, vector<1x128xf32>
    %6 = vector.broadcast %5 : vector<1x128xf32> to vector<8x128xf32>
    %7 = arith.addf %4, %6 : vector<8x128xf32>
    %cst_6 = arith.constant 0.000000e+00 : f32
    %8 = vector.broadcast %cst_6 : f32 to vector<8x128xf32>
    %9 = arith.maximumf %7, %8 : vector<8x128xf32>
    %10 = arith.truncf %9 : vector<8x128xf32> to vector<8x128xbf16>
    %c1 = arith.constant 1 : index
    %c0_7 = arith.constant 0 : index
    %c0_8 = arith.constant 0 : index
    %11 = vector.load %arg1[%c1, %c0_7, %c0_8] : memref<8x128x128xbf16, #tpu.memory_space<vmem>>, vector<1x128x128xbf16>
    %12 = vector.shape_cast %11 : vector<1x128x128xbf16> to vector<128x128xbf16>
    %cst_9 = arith.constant dense<0.000000e+00> : vector<8x128xf32>
    %13 = tpu.matmul %10, %12, %cst_9 {dimension_numbers = #tpu.dot_dimension_numbers<[1], [0], [0], [1], [0, 0, 1, 1], [], []>} : vector<8x128xbf16>, vector<128x128xbf16>, vector<8x128xf32> -> vector<8x128xf32>
    %c1_10 = arith.constant 1 : index
    %c0_11 = arith.constant 0 : index
    %14 = vector.load %arg2[%c1_10, %c0_11] : memref<8x128xf32, #tpu.memory_space<vmem>>, vector<1x128xf32>
    %15 = vector.broadcast %14 : vector<1x128xf32> to vector<8x128xf32>
    %16 = arith.addf %13, %15 : vector<8x128xf32>
    %17 = arith.truncf %16 : vector<8x128xf32> to vector<8x128xbf16>
    %c2 = arith.constant 2 : index
    %c0_12 = arith.constant 0 : index
    %c0_13 = arith.constant 0 : index
    %18 = vector.load %arg1[%c2, %c0_12, %c0_13] : memref<8x128x128xbf16, #tpu.memory_space<vmem>>, vector<1x128x128xbf16>
    %19 = vector.shape_cast %18 : vector<1x128x128xbf16> to vector<128x128xbf16>
    %cst_14 = arith.constant dense<0.000000e+00> : vector<8x128xf32>
    %20 = tpu.matmul %17, %19, %cst_14 {dimension_numbers = #tpu.dot_dimension_numbers<[1], [0], [0], [1], [0, 0, 1, 1], [], []>} : vector<8x128xbf16>, vector<128x128xbf16>, vector<8x128xf32> -> vector<8x128xf32>
    %c2_15 = arith.constant 2 : index
    %c0_16 = arith.constant 0 : index
    %21 = vector.load %arg2[%c2_15, %c0_16] : memref<8x128xf32, #tpu.memory_space<vmem>>, vector<1x128xf32>
    %22 = vector.broadcast %21 : vector<1x128xf32> to vector<8x128xf32>
    %23 = arith.addf %20, %22 : vector<8x128xf32>
    %cst_17 = arith.constant 0.000000e+00 : f32
    %24 = vector.broadcast %cst_17 : f32 to vector<8x128xf32>
    %25 = arith.maximumf %23, %24 : vector<8x128xf32>
    %26 = arith.truncf %25 : vector<8x128xf32> to vector<8x128xbf16>
    %c3 = arith.constant 3 : index
    %c0_18 = arith.constant 0 : index
    %c0_19 = arith.constant 0 : index
    %27 = vector.load %arg1[%c3, %c0_18, %c0_19] : memref<8x128x128xbf16, #tpu.memory_space<vmem>>, vector<1x128x128xbf16>
    %28 = vector.shape_cast %27 : vector<1x128x128xbf16> to vector<128x128xbf16>
    %cst_20 = arith.constant dense<0.000000e+00> : vector<8x128xf32>
    %29 = tpu.matmul %26, %28, %cst_20 {dimension_numbers = #tpu.dot_dimension_numbers<[1], [0], [0], [1], [0, 0, 1, 1], [], []>} : vector<8x128xbf16>, vector<128x128xbf16>, vector<8x128xf32> -> vector<8x128xf32>
    %c3_21 = arith.constant 3 : index
    %c0_22 = arith.constant 0 : index
    %30 = vector.load %arg2[%c3_21, %c0_22] : memref<8x128xf32, #tpu.memory_space<vmem>>, vector<1x128xf32>
    %31 = vector.broadcast %30 : vector<1x128xf32> to vector<8x128xf32>
    %32 = arith.addf %29, %31 : vector<8x128xf32>
    %c0_23 = arith.constant 0 : index
    %c0_24 = arith.constant 0 : index
    %33 = vector.load %arg3[%c0_23, %c0_24] : memref<8x128xf32, #tpu.memory_space<vmem>>, vector<8x128xf32>
    tpu.vector_store %arg3[%c0_23, %c0_24], %16 {strides = array<i32>} : memref<8x128xf32, #tpu.memory_space<vmem>>, vector<8x128xf32>,
    %c0_25 = arith.constant 0 : index
    %c0_26 = arith.constant 0 : index
    %34 = vector.load %arg4[%c0_25, %c0_26] : memref<8x128xf32, #tpu.memory_space<vmem>>, vector<8x128xf32>
    tpu.vector_store %arg4[%c0_25, %c0_26], %32 {strides = array<i32>} : memref<8x128xf32, #tpu.memory_space<vmem>>, vector<8x128xf32>,
    return
  }
}

</mosaic_0001>

<bundles_post_ra>
// kernel: semantic_head.1
= control target key start
LH: loop header
LB: loop body
LE: loop exit
PB: predicated region body
PF: predicated region fallthrough
CT: control target
= control target key end

     0   :  { %10 = vsyncpa [#allocation3], 0  ;;  %s799_s0 = inlined_call_operand.vmem [shape: f32[8,64], index: 0, kind: input, shape index: {}]   ;;  %s800_s1 = inlined_call_operand.hbm [shape: bf16[8,128,128], index: 1, kind: input, shape index: {}]   ;;  %s801_s2 = inlined_call_operand.vmem [shape: f32[8,128], index: 2, kind: input, shape index: {}]   ;;  %s802_s3 = inlined_call_operand.hbm [shape: f32[8,128], index: 3, kind: output, shape index: {0}]   ;;  %s803_s4 = inlined_call_operand.vmem [shape: f32[8,128], index: 4, kind: output, shape index: {1}]  }
   0x1   :  { %11 = vsyncpa [#allocation4], 0  ;;  %s690_s15 = smov [#allocation2]   ;;  %s642_s19 = scalar_lea.hbm %s800_s1, 8192 }
   0x2   :  { %s19_s16 = sshll.u32 %s690_s15, 4  ;;  %p643_p0 = scmp.ne.s32.totalorder %s800_s1, %s642_s19  ;;  %s20_s16 = int_to_ptr.vmem [resolvable:$true] %s19_s16 }
   0x3   :  { %p646_p1 = scmp.lt.u32.totalorder %s642_s19, %s800_s1 }
   0x5   :  { %p648_p2 = pnand %p646_p1, %p643_p0 }
   0x7   :  { %651 = shalt.err (!%p648_p2)
}
   0x8   :  { %s652_s24 = scalar_lea.vmem %s20_s16, 8192  ;;  %p657_p4 = scmp.lt.s32.totalorder %s20_s16, %s20_s16 }
   0x9   :  { %p653_p3 = scmp.ne.s32.totalorder %s20_s16, %s652_s24  ;;  %p658_p5 = scmp.lt.s32.totalorder %s652_s24, %s652_s24 }
   0xb   :  { %p659_p6 = por %p658_p5, %p657_p4 }
   0xd   :  { %p660_p7 = pnand %p659_p6, %p653_p3 }
   0xf   :  { %663 = shalt.err (!%p660_p7)
}
  0x10   :  { %s691_s25 = smov 64   ;;  %s692_s26 = smov 4  }
  0x11   :  { %25 = dma.hbm_to_vmem [thread:$0]  %s800_s1, 8192, %s20_s16, [#allocation3], %s691_s25, %s691_s25, %s692_s26  }
  0x12   :  { %686 = dma.done.wait [#allocation3], 8192  }
  0x13   :  { %687 = vsyncadd [#allocation3], 4294959104  ;;  %v693_v0 = vmov 0.0   ;;  %vm694_vm0 = vmmov 0   ;;  %v614_v1 = vld [vmem:[#allocation2] sm:$0xff]   ;;  %v615_v2 = vld [vmem:[#allocation2 + $0x8] sm:$0xff]  }
  0x14   :  { %536 = vmatprep.subr.bf16.mxu0 %v693_v0  ;;  %544 = vmatprep.mubr.msk.bf16.mxu0 %vm694_vm0, %v693_v0  ;;  %v618_v3 = vld [vmem:[#allocation2 + $0x40] sm:$0xff]   ;;  %v616_v4 = vld [vmem:[#allocation2 + $0x10] sm:$0xff]   ;;  %v619_v5 = vld [vmem:[#allocation2 + $0x48] sm:$0xff]   ;;  %vm71_vm1 = vcmask 523264   ;;  %s695_s9 = smov [#allocation5]  }
  0x15   :  { %548 = vmatprep.subr.bf16.mxu1 %v693_v0  ;;  %564 = vmatprep.mubr.msk.bf16.mxu1 %vm694_vm0, %v693_v0  ;;  %v617_v6 = vld [vmem:[#allocation2 + $0x18] sm:$0xff]   ;;  %v32_v7 = vld [vmem:[%s799_s0] sm:$0xff]  ;;  %v620_v8 = vld [vmem:[#allocation2 + $0x50] sm:$0xff]   ;;  %s458_s10 = sshll.u32 %s695_s9, 4  ;;  %s459_s10 = int_to_ptr.vmem [resolvable:$true] %s458_s10 }
  0x16   :  { %537 = vmatpush3.bf16.msra.mxu0 %v614_v1  ;;  %549 = vmatpush3.bf16.msra.mxu1 %v618_v3  ;;  %v33_v9 = vpack.c.bf16 %v32_v7, %v32_v7  ;;  %v621_v10 = vld [vmem:[#allocation2 + $0x58] sm:$0xff]   ;;  %v622_v11 = vld [vmem:[#allocation2 + $0x60] sm:$0xff]   ;;  %v623_v12 = vld [vmem:[#allocation2 + $0x68] sm:$0xff]   ;;  %s664_s11 = scalar_lea.vmem %s459_s10, 128  ;;  %p669_p9 = scmp.lt.s32.totalorder %s459_s10, %s459_s10 }
  0x17   :  { %538 = vmatprep.subr.bf16.mxu0 %v693_v0  ;;  %550 = vmatprep.subr.bf16.mxu1 %v693_v0  ;;  %v624_v13 = vld [vmem:[#allocation2 + $0x70] sm:$0xff]   ;;  %v625_v14 = vld [vmem:[#allocation2 + $0x78] sm:$0xff]   ;;  %v626_v15 = vld [vmem:[#allocation2 + $0x80] sm:$0xff]   ;;  %p665_p8 = scmp.ne.s32.totalorder %s459_s10, %s664_s11  ;;  %p670_p10 = scmp.lt.s32.totalorder %s664_s11, %s664_s11 }
  0x18   :  { %v627_v16 = vld [vmem:[#allocation2 + $0x88] sm:$0xff]   ;;  %v628_v17 = vld [vmem:[#allocation2 + $0x90] sm:$0xff]   ;;  %v629_v18 = vld [vmem:[#allocation2 + $0x98] sm:$0xff]  }
  0x19   :  { %v630_v19 = vld [vmem:[#allocation2 + $0xa0] sm:$0xff]   ;;  %v631_v20 = vld [vmem:[#allocation2 + $0xa8] sm:$0xff]   ;;  %v632_v21 = vld [vmem:[#allocation2 + $0xb0] sm:$0xff]   ;;  %p671_p11 = por %p670_p10, %p669_p9 }
  0x1a   :  { %539 = vmatpush3.bf16.msra.mxu0 %v615_v2  ;;  %551 = vmatpush3.bf16.msra.mxu1 %v619_v5  ;;  %v471_v22 = vld [vmem:[%s801_s2] ss:$0 sm:$0xff]  ;;  %v633_v30 = vld [vmem:[#allocation2 + $0xb8] sm:$0xff]   ;;  %v635_v32 = vld [vmem:[#allocation2 + $0xc8] sm:$0xff]  }
  0x1b   :  { %540 = vmatprep.subr.bf16.mxu0 %v693_v0  ;;  %552 = vmatprep.subr.bf16.mxu1 %v693_v0  ;;  %v634_v31 = vld [vmem:[#allocation2 + $0xc0] sm:$0xff]   ;;  %v636_v33 = vld [vmem:[#allocation2 + $0xd0] sm:$0xff]   ;;  %v637_v34 = vld [vmem:[#allocation2 + $0xd8] sm:$0xff]   ;;  %p672_p12 = pnand %p671_p11, %p665_p8 }
  0x1c   :  { %v638_v35 = vld [vmem:[#allocation2 + $0xe0] sm:$0xff]   ;;  %v639_v36 = vld [vmem:[#allocation2 + $0xe8] sm:$0xff]   ;;  %v640_v44 = vld [vmem:[#allocation2 + $0xf0] sm:$0xff]  }
  0x1d   :  { %v477_v37 = vld [vmem:[%s801_s2 + $0x1] ss:$0 sm:$0xff]  ;;  %v641_v45 = vld [vmem:[#allocation2 + $0xf8] sm:$0xff]   ;;  %v486_v46 = vld [vmem:[%s801_s2 + $0x2] ss:$0 sm:$0xff] }
  0x1e   :  { %541 = vmatpush3.bf16.msra.mxu0 %v616_v4  ;;  %553 = vmatpush3.bf16.msra.mxu1 %v620_v8 }
  0x1f   :  { %542 = vmatprep.subr.bf16.mxu0 %v693_v0  ;;  %554 = vmatprep.subr.bf16.mxu1 %v693_v0 }
  0x22   :  { %543 = vmatpush3.bf16.msra.mxu0 %v617_v6  ;;  %555 = vmatpush3.bf16.msra.mxu1 %v621_v10 }
  0x23   :  { %568 = vmatprep.subr.bf16.mxu0 %v693_v0  ;;  %556 = vmatprep.subr.bf16.mxu1 %v693_v0 }
  0x25   :  { %545 = vmatmul.mubr.msk.bf16.vlgmr.msra.gmra.mrb[0].mxu0 %vm71_vm1, %v33_v9 }
  0x26   :  { %584 = vmatprep.mubr.msk.bf16.mxu0 %vm694_vm0, %v693_v0  ;;  %557 = vmatpush3.bf16.msra.mxu1 %v622_v11 }
  0x27   :  { %558 = vmatprep.subr.bf16.mxu1 %v693_v0  ;;  %569 = vmatpush3.bf16.msra.mxu0 %v626_v15 }
  0x28   :  { %570 = vmatprep.subr.bf16.mxu0 %v693_v0 }
  0x2a   :  { %559 = vmatpush3.bf16.msra.mxu1 %v623_v12 }
  0x2b   :  { %560 = vmatprep.subr.bf16.mxu1 %v693_v0  ;;  %571 = vmatpush3.bf16.msra.mxu0 %v627_v16 }
  0x2c   :  { %572 = vmatprep.subr.bf16.mxu0 %v693_v0 }
  0x2e   :  { %561 = vmatpush3.bf16.msra.mxu1 %v624_v13 }
  0x2f   :  { %562 = vmatprep.subr.bf16.mxu1 %v693_v0  ;;  %573 = vmatpush3.bf16.msra.mxu0 %v628_v17 }
  0x30   :  { %574 = vmatprep.subr.bf16.mxu0 %v693_v0 }
  0x32   :  { %563 = vmatpush3.bf16.msra.mxu1 %v625_v14 }
  0x33   :  { %588 = vmatprep.subr.bf16.mxu1 %v693_v0  ;;  %575 = vmatpush3.bf16.msra.mxu0 %v629_v18 }
  0x34   :  { %576 = vmatprep.subr.bf16.mxu0 %v693_v0 }
  0x37   :  { %577 = vmatpush3.bf16.msra.mxu0 %v630_v19 }
  0x38   :  { %578 = vmatprep.subr.bf16.mxu0 %v693_v0 }
  0x3b   :  { %579 = vmatpush3.bf16.msra.mxu0 %v631_v20 }
  0x3c   :  { %580 = vmatprep.subr.bf16.mxu0 %v693_v0 }
  0x3f   :  { %581 = vmatpush3.bf16.msra.mxu0 %v632_v21 }
  0x40   :  { %582 = vmatprep.subr.bf16.mxu0 %v693_v0 }
  0x43   :  { %583 = vmatpush3.bf16.msra.mxu0 %v633_v30 }
  0xf8   :  { %v109_v23 = vpop.f32.mrb[0].mxu0 }
  0xf9   :  { %v110_v24 = vadd.f32 %v471_v22, %v109_v23  ;;  %v546_v25 = vpop.f32.mrb[1].mxu0 }
  0xfa   :  { %v112_v26 = vpop.f32.mrb[2].mxu0 }
  0xfb   :  { %v115_v27 = vmax.f32 %v110_v24, 0.0  ;;  %v547_v28 = vpop.f32.mrb[3].mxu0 }
  0xfd   :  { %v116_v29 = vpack.c.bf16 %v115_v27, %v115_v27 }
  0xff   :  { %565 = vmatmul.mubr.bf16.vlgmr.msra.gmra.mrb[0].mxu1 %v116_v29 }
 0x100   :  { %604 = vmatprep.mubr.msk.bf16.mxu1 %vm694_vm0, %v693_v0  ;;  %589 = vmatpush3.bf16.msra.mxu1 %v634_v31 }
 0x101   :  { %590 = vmatprep.subr.bf16.mxu1 %v693_v0 }
 0x104   :  { %591 = vmatpush3.bf16.msra.mxu1 %v635_v32 }
 0x105   :  { %592 = vmatprep.subr.bf16.mxu1 %v693_v0 }
 0x108   :  { %593 = vmatpush3.bf16.msra.mxu1 %v636_v33 }
 0x109   :  { %594 = vmatprep.subr.bf16.mxu1 %v693_v0 }
 0x10c   :  { %595 = vmatpush3.bf16.msra.mxu1 %v637_v34 }
 0x10d   :  { %596 = vmatprep.subr.bf16.mxu1 %v693_v0 }
 0x110   :  { %597 = vmatpush3.bf16.msra.mxu1 %v638_v35 }
 0x111   :  { %598 = vmatprep.subr.bf16.mxu1 %v693_v0 }
 0x114   :  { %599 = vmatpush3.bf16.msra.mxu1 %v639_v36 }
 0x115   :  { %600 = vmatprep.subr.bf16.mxu1 %v693_v0 }
 0x118   :  { %601 = vmatpush3.bf16.msra.mxu1 %v640_v44 }
 0x119   :  { %602 = vmatprep.subr.bf16.mxu1 %v693_v0 }
 0x11c   :  { %603 = vmatpush3.bf16.msra.mxu1 %v641_v45 }
 0x1d2   :  { %v221_v38 = vpop.f32.mrb[0].mxu1 }
 0x1d3   :  { %v222_v39 = vadd.f32 %v477_v37, %v221_v38  ;;  %v566_v40 = vpop.f32.mrb[1].mxu1 }
 0x1d4   :  { %v224_v41 = vpop.f32.mrb[2].mxu1 }
 0x1d5   :  { %v227_v42 = vpack.c.bf16 %v222_v39, %v222_v39  ;;  %450 = vst [vmem:[#allocation5] sm:$0xff] %v222_v39  ;;  %v567_v43 = vpop.f32.mrb[3].mxu1 }
 0x1d7   :  { %585 = vmatmul.mubr.bf16.vlgmr.msra.gmra.mrb[4].mxu0 %v227_v42 }
 0x2aa   :  { %v332_v47 = vpop.f32.mrb[4].mxu0 }
 0x2ab   :  { %v333_v48 = vadd.f32 %v486_v46, %v332_v47  ;;  %v586_v49 = vpop.f32.mrb[5].mxu0 }
 0x2ac   :  { %v335_v50 = vpop.f32.mrb[6].mxu0 }
 0x2ad   :  { %v338_v51 = vmax.f32 %v333_v48, 0.0  ;;  %v587_v52 = vpop.f32.mrb[7].mxu0 }
 0x2af   :  { %v339_v53 = vpack.c.bf16 %v338_v51, %v338_v51 }
 0x2b1   :  { %605 = vmatmul.mubr.bf16.vlgmr.msra.gmra.mrb[4].mxu1 %v339_v53 }
 0x2b2   :  { %675 = shalt.err (!%p672_p12)
}
 0x2b3   :  { %s676_s14 = scalar_lea.hbm %s802_s3, 128 }
 0x2b4   :  { %p677_p13 = scmp.ne.s32.totalorder %s802_s3, %s676_s14  ;;  %p680_p0 = scmp.lt.u32.totalorder %s676_s14, %s802_s3 }
 0x2b6   :  { %p682_p1 = pnand %p680_p0, %p677_p13 }
 0x2b8   :  { %685 = shalt.err (!%p682_p1)
}
 0x2b9   :  { %461 = dma.vmem_to_hbm [thread:$0]  %s459_s10, 128, %s802_s3, [#allocation4]   ;;  %v495_v54 = vld [vmem:[%s801_s2 + $0x3] ss:$0 sm:$0xff] }
 0x384   :  { %v444_v55 = vpop.f32.mrb[4].mxu1 }
 0x385   :  { %v445_v56 = vadd.f32 %v495_v54, %v444_v55  ;;  %v606_v57 = vpop.f32.mrb[5].mxu1 }
 0x386   :  { %v447_v58 = vpop.f32.mrb[6].mxu1 }
 0x387   :  { %451 = vst [vmem:[%s803_s4] sm:$0xff] %v445_v56  ;;  %v607_v59 = vpop.f32.mrb[7].mxu1 }
 0x388   :  { %688 = dma.done.wait [#allocation4], 128  }
 0x389   :  { %689 = vsyncadd [#allocation4], 4294967168 }
 0x38a   :  { %469 = vsyncpa [#allocation3], 1 }
 0x38b   :  { %470 = vsyncpa [#allocation4], 1 }

</bundles_post_ra>
